<compile_context>
chip_gen: v7x
topology: tpu7x:2x2x1
jax: 0.10.0
libtpu: 0.0.40
codegen_flags: <defaults>
</compile_context>

<pallas_src>
import jax
import jax.numpy as jnp
from jax.experimental import pallas as pl
from jax.experimental.pallas import tpu as pltpu


# ----------------------------------------------------------------------------
# Kernel: pure element-wise copy of one (rows, lanes) tile.
def _identity_kernel(x_ref, o_ref):
    o_ref[...] = x_ref[...]


# ----------------------------------------------------------------------------
# Helpers: lane-dense flattening + row tiling.
def _flatten_lane_dense(x):
    """Reshape to 2-D with the last dim as lane-dense as possible."""
    total = x.size
    if total % 128 == 0:
        c = 128
        # Widen the lane dim (up to 2048) while it still divides the total:
        # full-width unmasked stores instead of masked vst.msk.
        while c * 2 <= 2048 and total % (c * 2) == 0:
            c *= 2
        return x.reshape(total // c, c)
    if x.ndim >= 2:
        return x.reshape(-1, x.shape[-1])
    return x.reshape(1, total)


def _pallas_identity(x):
    """Materializing copy through VMEM with large, aligned blocks."""
    x2 = _flatten_lane_dense(x)
    r, c = x2.shape
    itemsize = jnp.dtype(x2.dtype).itemsize

    if r <= 8:
        # Tiny tensor: single block covering the full extent (allowed even if
        # r is not a multiple of 8 because it equals the full array dim).
        rb = r
    else:
        # ~1 MiB per block (×2 for double buffering ≪ 64 MiB v7x VMEM),
        # rounded down to a multiple of 8 sublanes.
        rb = min(r, max(8, (1 << 20) // max(1, c * itemsize)))
        rb = max(8, (rb // 8) * 8)

    grid = (pl.cdiv(r, rb),)

    y2 = pl.pallas_call(
        _identity_kernel,
        out_shape=jax.ShapeDtypeStruct((r, c), x2.dtype),
        grid=grid,
        in_specs=[pl.BlockSpec((rb, c), lambda i: (i, 0))],
        out_specs=pl.BlockSpec((rb, c), lambda i: (i, 0)),
        compiler_params=pltpu.CompilerParams(
            dimension_semantics=("parallel",),      # lets v7x split rows across 2 TCs
            vmem_limit_bytes=32 * 1024 * 1024,      # safe on v5e/v6e/v7x
        ),
    )(x2)
    return y2.reshape(x.shape)


# ----------------------------------------------------------------------------
# Module wrapper (mirrors SelectItem.__init__ / forward).
class SelectItemPallas:
    """Select one item from a tuple output of a previous module."""

    def __init__(self, item_index, materialize=False):
        self._name = "selectitem"
        self.item_index = item_index
        # materialize=False: zero-copy pass-through (fastest — no HBM traffic,
        #                    no kernel launch; this is the recommended path).
        # materialize=True : run the selected tensor through the Pallas
        #                    identity kernel (fresh contiguous buffer).
        self.materialize = materialize

    def __call__(self, inputs):
        out = inputs[self.item_index]
        if not self.materialize or not isinstance(out, jax.Array):
            return out
        return _pallas_identity(out)


# ----------------------------------------------------------------------------
if __name__ == "__main__":
    key = jax.random.PRNGKey(0)
    B, T, d = 2, 8, 32           # small RNN-like shapes (batch_first output)
    num_layers = 1

    k0, k1 = jax.random.split(key, 2)
    rnn_output = jax.random.normal(k0, (B, T, d), dtype=jnp.float32)
    rnn_hidden = jax.random.normal(k1, (num_layers, B, d), dtype=jnp.float32)
    inputs = (rnn_output, rnn_hidden)

    ok = True

    # 1) Select item 0 (rnn output), materialized through the Pallas kernel.
    mod0 = SelectItemPallas(0, materialize=True)
    y0 = jax.block_until_ready(mod0(inputs))
    ok &= y0.shape == rnn_output.shape and bool(jnp.allclose(y0, rnn_output))

    # 2) Select item 1 (rnn hidden), materialized through the Pallas kernel
    #    (total elements not 128-divisible -> natural 2-D fallback path).
    mod1 = SelectItemPallas(1, materialize=True)
    y1 = jax.block_until_ready(mod1(inputs))
    ok &= y1.shape == rnn_hidden.shape and bool(jnp.allclose(y1, rnn_hidden))

    # 3) Default (recommended) zero-copy path: plain tuple indexing, no kernel.
    mod_fast = SelectItemPallas(0)
    y_fast = jax.block_until_ready(mod_fast(inputs))
    ok &= y_fast.shape == rnn_output.shape and bool(jnp.allclose(y_fast, rnn_output))

    if ok:
        print("KERNEL_OK")
    else:
        raise SystemExit("mismatch vs reference")
</pallas_src>

<mosaic_0001>
module attributes {stable_mosaic.version = 11 : i64} {
  func.func @_identity_kernel(%arg0: i32, %arg1: memref<1x512xf32, #tpu.memory_space<vmem>>, %arg2: memref<1x512xf32, #tpu.memory_space<vmem>>) attributes {dimension_semantics = [#tpu.dimension_semantics<parallel>], iteration_bounds = array<i64: 1>, scalar_prefetch = 0 : i64, scratch_operands = 0 : i64, tpu.core_type = #tpu.core_type<tc>, window_params = [{transform_indices = @transform_0, window_bounds = array<i64: 1, 512>}, {transform_indices = @transform_1, window_bounds = array<i64: 1, 512>}]} {
    %c0 = arith.constant 0 : index
    %c0_0 = arith.constant 0 : index
    %0 = vector.load %arg1[%c0, %c0_0] : memref<1x512xf32, #tpu.memory_space<vmem>>, vector<1x512xf32>
    %c0_1 = arith.constant 0 : index
    %c0_2 = arith.constant 0 : index
    %1 = vector.load %arg2[%c0_1, %c0_2] : memref<1x512xf32, #tpu.memory_space<vmem>>, vector<1x512xf32>
    tpu.vector_store %arg2[%c0_1, %c0_2], %0 {strides = array<i32>} : memref<1x512xf32, #tpu.memory_space<vmem>>, vector<1x512xf32>,
    return
  }
  func.func @transform_0(%arg0: i32) -> (i32, i32) {
    %c0_i32 = arith.constant 0 : i32
    %c0_i32_0 = arith.constant 0 : i32
    return %arg0, %c0_i32 : i32, i32
  }
  func.func @transform_1(%arg0: i32) -> (i32, i32) {
    %c0_i32 = arith.constant 0 : i32
    %c0_i32_0 = arith.constant 0 : i32
    return %arg0, %c0_i32 : i32, i32
  }
}

</mosaic_0001>

<bundles_post_ra>
// kernel: tpu_custom_call.1
= control target key start
LH: loop header
LB: loop body
LE: loop exit
PB: predicated region body
PF: predicated region fallthrough
CT: control target
= control target key end

     0   :  { %6 = vsyncpa [#allocation3], 0  ;;  %s128_s0 = inlined_call_operand.hbm [shape: f32[1,512], index: 0, kind: input, shape index: {}]   ;;  %s129_s1 = inlined_call_operand.hbm [shape: f32[1,512], index: 1, kind: output, shape index: {}]  }
   0x1   :  { %7 = vsyncpa [#allocation4], 0  ;;  %s92_s6 = smov [#allocation2]   ;;  %s44_s10 = scalar_lea.hbm %s128_s0, 64 }
   0x2   :  { %s14_s7 = sshll.u32 %s92_s6, 4  ;;  %p45_p0 = scmp.ne.s32.totalorder %s128_s0, %s44_s10  ;;  %s15_s7 = int_to_ptr.vmem [resolvable:$true] %s14_s7 }
   0x3   :  { %p48_p1 = scmp.lt.u32.totalorder %s44_s10, %s128_s0 }
   0x5   :  { %p50_p2 = pnand %p48_p1, %p45_p0 }
   0x7   :  { %53 = shalt.err (!%p50_p2)
}
   0x8   :  { %s54_s15 = scalar_lea.vmem %s15_s7, 64  ;;  %p59_p4 = scmp.lt.s32.totalorder %s15_s7, %s15_s7 }
   0x9   :  { %p55_p3 = scmp.ne.s32.totalorder %s15_s7, %s54_s15  ;;  %p60_p5 = scmp.lt.s32.totalorder %s54_s15, %s54_s15 }
   0xb   :  { %p61_p6 = por %p60_p5, %p59_p4 }
   0xd   :  { %p62_p7 = pnand %p61_p6, %p55_p3 }
   0xf   :  { %65 = shalt.err (!%p62_p7)
}
  0x10   :  { %17 = dma.hbm_to_vmem [thread:$0]  %s128_s0, 64, %s15_s7, [#allocation3]  }
  0x11   :  { %88 = dma.done.wait [#allocation3], 64  }
  0x12   :  { %89 = vsyncadd [#allocation3], 4294967232  ;;  %v22_v0 = vlaneseq  ;;  %s93_s18 = smov [#allocation5]   ;;  %v21_v1 = vld [vmem:[#allocation2] sm:$0xf] }
  0x13   :  { %s33_s19 = sshll.u32 %s93_s18, 4  ;;  %s34_s19 = int_to_ptr.vmem [resolvable:$true] %s33_s19 }
  0x14   :  { %vm24_vm0 = vcmp.lt.s32.totalorder %v22_v0, 512  ;;  %s66_s20 = scalar_lea.vmem %s34_s19, 64  ;;  %p71_p9 = scmp.lt.s32.totalorder %s34_s19, %s34_s19 }
  0x15   :  { %26 = vst.msk [vmem:[#allocation5] sm:$0xf] %vm24_vm0, %v21_v1  ;;  %p67_p8 = scmp.ne.s32.totalorder %s34_s19, %s66_s20  ;;  %p72_p10 = scmp.lt.s32.totalorder %s66_s20, %s66_s20 }
  0x17   :  { %p73_p11 = por %p72_p10, %p71_p9 }
  0x19   :  { %p74_p12 = pnand %p73_p11, %p67_p8 }
  0x1b   :  { %77 = shalt.err (!%p74_p12)
}
  0x1c   :  { %s78_s0 = scalar_lea.hbm %s129_s1, 64 }
  0x1d   :  { %p79_p13 = scmp.ne.s32.totalorder %s129_s1, %s78_s0  ;;  %p82_p0 = scmp.lt.u32.totalorder %s78_s0, %s129_s1 }
  0x1f   :  { %p84_p1 = pnand %p82_p0, %p79_p13 }
  0x21   :  { %87 = shalt.err (!%p84_p1)
}
  0x22   :  { %36 = dma.vmem_to_hbm [thread:$0]  %s34_s19, 64, %s129_s1, [#allocation4]  }
  0x23   :  { %90 = dma.done.wait [#allocation4], 64  }
  0x24   :  { %91 = vsyncadd [#allocation4], 4294967232 }
  0x25   :  { %40 = vsyncpa [#allocation3], 1 }
  0x26   :  { %41 = vsyncpa [#allocation4], 1 }

</bundles_post_ra>
